<compile_context>
chip_gen: v7x
topology: tpu7x:2x2x1
jax: 0.10.0
libtpu: 0.0.40
codegen_flags: <defaults>
</compile_context>

<pallas_src>
import math
import jax
import jax.numpy as jnp
from jax import lax
from jax.experimental import pallas as pl
from jax.experimental.pallas import tpu as pltpu  # noqa: F401  (TPU backend)

TINY = 1e-10

# ---------------- hyper-parameters (small, consistent with the module) -------
NUM_TOPICS  = 8      # K
NUM_TIMES   = 4      # T
VOCAB       = 128    # V
RHO         = 40     # rho_size (divisible by num_heads = 10)
T_HIDDEN    = 32
ETA_HIDDEN  = 32
ETA_NLAYERS = 2
NUM_HEADS   = 10
DELTA       = 0.005
BATCH       = 8
NUM_DOCS    = 40.0
# enc_drop = 0, eta_dropout = 0, citation = False, train_embeddings = False


# ============================ Pallas kernels =================================

def _beta_nll_kernel(alpha_ref, rho_ref, theta_ref, bows_ref, times_ref, out_ref):
    """Fused: beta = softmax_V(alpha @ rho_t); loglik[b] = theta[b] @ beta[times[b]];
    out = sum_b -(log(loglik + TINY) * bows[b]).sum(V).

    Shapes: alpha_ref (T*K, R), rho_ref (R, V), theta_ref (B, K),
            bows_ref (B, V), times_ref (B, 1) int32, out_ref (1, 1) f32.
    """
    # --- beta: one MXU pass over all (t, k) rows, row-softmax over V ----------
    logit = jnp.dot(alpha_ref[...], rho_ref[...],
                    preferred_element_type=jnp.float32)          # (T*K, V)
    m = jnp.max(logit, axis=-1, keepdims=True)
    e = jnp.exp(logit - m)
    beta = e / jnp.sum(e, axis=-1, keepdims=True)                # (T*K, V)

    theta = theta_ref[...]                                       # (B, K)
    bows = bows_ref[...]                                         # (B, V)
    tvec = times_ref[...]                                        # (B, 1) int32

    # --- per-doc time selection via one-hot mask (never materialize beta_td) -
    B = theta.shape[0]
    V = beta.shape[1]
    loglik = jnp.zeros((B, V), jnp.float32)
    for t in range(NUM_TIMES):                                   # static unroll, T=4
        beta_t = beta[t * NUM_TOPICS:(t + 1) * NUM_TOPICS, :]    # (K, V), sublane-aligned slice
        ll_t = jnp.dot(theta, beta_t, preferred_element_type=jnp.float32)  # (B, V)
        mask = (tvec == t).astype(jnp.float32)                   # (B, 1)
        loglik = loglik + mask * ll_t

    nll_bv = -(jnp.log(loglik + TINY) * bows)                    # (B, V)
    nll_col = jnp.sum(nll_bv, axis=-1, keepdims=True)            # (B, 1)  lane reduce
    out_ref[...] = jnp.sum(nll_col, axis=0, keepdims=True)       # (1, 1)  sublane reduce


def beta_nll_pallas(alpha, rho_t, theta, bows, times):
    """alpha (T,K,R), rho_t (R,V), theta (B,K), bows (B,V), times (B,) -> scalar sum_b nll_b."""
    T, K, R = alpha.shape
    alpha_flat = alpha.reshape(T * K, R)                 # contiguous merge of leading dims
    times2d = times.astype(jnp.int32)[:, None]           # (B, 1)
    out = pl.pallas_call(
        _beta_nll_kernel,
        out_shape=jax.ShapeDtypeStruct((1, 1), jnp.float32),
    )(alpha_flat, rho_t, theta, bows, times2d)
    return out[0, 0]


def _theta_mlp_kernel(bows_ref, eta_ref, w1v_ref, w1e_ref, b1_ref,
                      w2_ref, b2_ref, wh_ref, bh_ref, out_ref):
    """q_theta MLP with split first layer (no V+K concat) and fused mu/logsigma head.

    bows (B, V), eta (B, K) -> out (B, 2K) = [mu | logsigma].
    """
    h = (jnp.dot(bows_ref[...], w1v_ref[...], preferred_element_type=jnp.float32)
         + jnp.dot(eta_ref[...], w1e_ref[...], preferred_element_type=jnp.float32)
         + b1_ref[...])
    h = jnp.maximum(h, 0.0)
    h = jnp.dot(h, w2_ref[...], preferred_element_type=jnp.float32) + b2_ref[...]
    h = jnp.maximum(h, 0.0)
    out_ref[...] = jnp.dot(h, wh_ref[...], preferred_element_type=jnp.float32) + bh_ref[...]


def theta_mlp_pallas(bows, eta_td, p):
    B = bows.shape[0]
    out = pl.pallas_call(
        _theta_mlp_kernel,
        out_shape=jax.ShapeDtypeStruct((B, 2 * NUM_TOPICS), jnp.float32),
    )(bows, eta_td,
      p['w_q1_bow'], p['w_q1_eta'], p['b_q1'],
      p['w_q2'], p['b_q2'],
      p['w_head_theta'], p['b_head_theta'])
    mu_theta = out[:, :NUM_TOPICS]
    ls_theta = out[:, NUM_TOPICS:]
    return mu_theta, ls_theta


# ============================ plain-JAX glue ==================================

def layer_norm(x, g, b, eps=1e-5):
    mu = x.mean(-1, keepdims=True)
    var = ((x - mu) ** 2).mean(-1, keepdims=True)
    return (x - mu) / jnp.sqrt(var + eps) * g + b


def get_kl(q_mu, q_ls, p_mu, p_ls):
    sq = jnp.exp(q_ls)
    sp = jnp.exp(p_ls)
    kl = (sq + (q_mu - p_mu) ** 2) / (sp + 1e-6)
    kl = kl - 1.0 + p_ls - q_ls
    return 0.5 * jnp.sum(kl, axis=-1)


def multihead_attn(q, k, v, p):
    # q: (1, L, E) ; k, v: (1, S, E)   (batch_first, batch = 1)
    E = q.shape[-1]
    h = NUM_HEADS
    hd = E // h
    L, S = q.shape[1], k.shape[1]
    qh = (q[0] @ p['w_q'] + p['b_q']).reshape(L, h, hd).transpose(1, 0, 2)
    kh = (k[0] @ p['w_k'] + p['b_k']).reshape(S, h, hd).transpose(1, 0, 2)
    vh = (v[0] @ p['w_v'] + p['b_v']).reshape(S, h, hd).transpose(1, 0, 2)
    scores = jnp.einsum('hld,hsd->hls', qh, kh) / math.sqrt(hd)
    attn = jax.nn.softmax(scores, axis=-1)                 # (h, L, S)
    out = jnp.einsum('hls,hsd->hld', attn, vh)             # (h, L, hd)
    out = out.transpose(1, 0, 2).reshape(L, E)
    out = out @ p['w_o'] + p['b_o']
    return out[None], attn.mean(axis=0)                    # (1,L,E), (L,S)


def get_attention(p):
    alpha = layer_norm(p['mu_0_alpha'], p['ln_g'], p['ln_b'])     # (1, K, R)
    alphas = [alpha[0]]
    attentions = {}
    cul_k = cul_v = None
    for t in range(1, NUM_TIMES):
        qkv = alpha @ p['w_qkv'] + p['b_qkv']                     # (1, K, 3R)
        q_t, k_t, v_t = jnp.split(qkv, 3, axis=-1)
        prev_alpha = alpha
        if t == 1:
            cul_k, cul_v = k_t, v_t
        else:
            cul_k = jnp.concatenate([cul_k, k_t], axis=1)
            cul_v = jnp.concatenate([cul_v, v_t], axis=1)
        attn_out, attn_w = multihead_attn(q_t, cul_k, cul_v, p)
        attentions[t] = attn_w
        alpha = layer_norm(attn_out + prev_alpha, p['ln_g'], p['ln_b'])
        alphas.append(alpha[0])
    return jnp.stack(alphas, axis=0), attentions                  # (T, K, R)


def get_alpha(p, key):
    outputs, attentions = get_attention(p)
    keys = jax.random.split(key, NUM_TIMES)
    alphas, kls = [], []
    q_mu = outputs[0] @ p['w_mu_alpha'] + p['b_mu_alpha']
    q_ls = outputs[0] @ p['w_ls_alpha'] + p['b_ls_alpha']
    eps = jax.random.normal(keys[0], q_mu.shape)
    alphas.append(q_mu + eps * jnp.exp(0.5 * q_ls))
    kls.append(get_kl(q_mu, q_ls, jnp.zeros_like(q_mu), jnp.zeros_like(q_ls)))
    for t in range(1, NUM_TIMES):
        q_mu = outputs[t] @ p['w_mu_alpha'] + p['b_mu_alpha']
        q_ls = outputs[t] @ p['w_ls_alpha'] + p['b_ls_alpha']
        eps = jax.random.normal(keys[t], q_mu.shape)
        alpha_t = q_mu + eps * jnp.exp(0.5 * q_ls)
        p_mu = alphas[t - 1]
        p_ls = jnp.log(DELTA * jnp.ones((NUM_TOPICS, RHO), jnp.float32))
        kls.append(get_kl(q_mu, q_ls, p_mu, p_ls))
        alphas.append(alpha_t)
    kl_alpha = jnp.stack(kls).sum()
    return jnp.stack(alphas, axis=0), attentions, kl_alpha


def lstm_forward(x, lstm_params):
    # x: (T, H_in), seq-major, batch = 1 (squeezed).  PyTorch gate order i,f,g,o.
    seq = x
    for lp in lstm_params:
        H = lp['w_hh'].shape[0]

        def step(carry, xt, lp=lp):
            h, c = carry
            gates = xt @ lp['w_ih'] + h @ lp['w_hh'] + lp['b_ih'] + lp['b_hh']
            i, f, g, o = jnp.split(gates, 4)
            i, f, o = jax.nn.sigmoid(i), jax.nn.sigmoid(f), jax.nn.sigmoid(o)
            g = jnp.tanh(g)
            c = f * c + i * g
            h = o * jnp.tanh(c)
            return (h, c), h

        init = (jnp.zeros((H,), jnp.float32), jnp.zeros((H,), jnp.float32))
        _, seq = lax.scan(step, init, seq)
    return seq  # (T, H)


def get_eta(p, rnn_inp, key):
    inp = rnn_inp @ p['w_eta_map'] + p['b_eta_map']   # (T, Heta)
    output = lstm_forward(inp, p['lstm'])             # (T, Heta)
    keys = jax.random.split(key, NUM_TIMES)
    etas, kls = [], []
    inp0 = jnp.concatenate([output[0], jnp.zeros((NUM_TOPICS,), jnp.float32)])
    mu0 = inp0 @ p['w_mu_eta'] + p['b_mu_eta']
    ls0 = inp0 @ p['w_ls_eta'] + p['b_ls_eta']
    eps = jax.random.normal(keys[0], mu0.shape)
    etas.append(mu0 + eps * jnp.exp(0.5 * ls0))
    kls.append(get_kl(mu0, ls0, jnp.zeros(NUM_TOPICS), jnp.zeros(NUM_TOPICS)))
    for t in range(1, NUM_TIMES):
        inp_t = jnp.concatenate([output[t], etas[t - 1]])
        mu_t = inp_t @ p['w_mu_eta'] + p['b_mu_eta']
        ls_t = inp_t @ p['w_ls_eta'] + p['b_ls_eta']
        eps = jax.random.normal(keys[t], mu_t.shape)
        etas.append(mu_t + eps * jnp.exp(0.5 * ls_t))
        p_ls = jnp.log(DELTA * jnp.ones((NUM_TOPICS,), jnp.float32))
        kls.append(get_kl(mu_t, ls_t, etas[t - 1], p_ls))
    kl_eta = jnp.stack(kls).sum()
    return jnp.stack(etas, axis=0), kl_eta


def get_theta(p, eta, bows, times, key):
    eta_td = eta[times]                                   # (B, K), tiny gather, needed for KL anyway
    mu_theta, ls_theta = theta_mlp_pallas(bows, eta_td, p)   # fused Pallas MLP
    # enc_drop = 0 -> dropout is a no-op
    eps = jax.random.normal(key, mu_theta.shape)
    z = mu_theta + eps * jnp.exp(0.5 * ls_theta)
    theta = jax.nn.softmax(z, axis=-1)
    kl_theta = get_kl(mu_theta, ls_theta, eta_td, jnp.zeros((NUM_TOPICS,), jnp.float32))
    return theta, kl_theta


def forward(p, bows, normalized_bows, times, rnn_inp, num_docs, key):
    bsz = normalized_bows.shape[0]
    coeff = num_docs / bsz
    k_alpha, k_eta, k_theta = jax.random.split(key, 3)

    alpha, alpha_attention, kl_alpha = get_alpha(p, k_alpha)
    eta, kl_eta = get_eta(p, rnn_inp, k_eta)
    theta, kl_theta = get_theta(p, eta, normalized_bows, times, k_theta)
    kl_theta = kl_theta.sum() * coeff

    # Fused Pallas hot path: beta (softmax over V), time-gather and NLL -> scalar.
    nll = beta_nll_pallas(alpha, p['rho_t'], theta, bows, times) * coeff

    # TODO(synk): citation-loss branch needs external citation data
    # (update_citation_data); citation=False / c_weight=0 here, so it is 0.
    citation_loss = jnp.float32(0.0)

    nelbo = nll + kl_eta + kl_theta + kl_alpha + citation_loss
    return nelbo, nll, kl_eta, kl_theta, kl_alpha, citation_loss


forward_jit = jax.jit(forward)


# ============================ parameter init =================================

def init_params(key):
    keys = jax.random.split(key, 64)
    ki = iter(keys)

    def rn(shape, scale=0.05):
        return (scale * jax.random.normal(next(ki), shape)).astype(jnp.float32)

    p = {}
    p['mu_0_alpha'] = rn((1, NUM_TOPICS, RHO), 0.1)
    p['w_mu_alpha'] = rn((RHO, RHO)); p['b_mu_alpha'] = rn((RHO,), 0.01)
    p['w_ls_alpha'] = rn((RHO, RHO)); p['b_ls_alpha'] = rn((RHO,), 0.01)
    p['w_qkv'] = rn((RHO, 3 * RHO)); p['b_qkv'] = rn((3 * RHO,), 0.01)
    p['w_q'] = rn((RHO, RHO)); p['b_q'] = rn((RHO,), 0.01)
    p['w_k'] = rn((RHO, RHO)); p['b_k'] = rn((RHO,), 0.01)
    p['w_v'] = rn((RHO, RHO)); p['b_v'] = rn((RHO,), 0.01)
    p['w_o'] = rn((RHO, RHO)); p['b_o'] = rn((RHO,), 0.01)
    p['ln_g'] = jnp.ones((RHO,), jnp.float32)
    p['ln_b'] = jnp.zeros((RHO,), jnp.float32)
    # fixed word embeddings (train_embeddings=False), stored PRE-TRANSPOSED
    # as (R, V) so the beta kernel reads a lane-dense weight directly.
    p['rho_t'] = rn((RHO, VOCAB), 0.1)
    # q_theta: first layer split into bow-part (V, H) and eta-part (K, H),
    # mu/logsigma heads fused into one (H, 2K) matrix; biases stored 2D.
    p['w_q1_bow'] = rn((VOCAB, T_HIDDEN))
    p['w_q1_eta'] = rn((NUM_TOPICS, T_HIDDEN))
    p['b_q1'] = rn((1, T_HIDDEN), 0.01)
    p['w_q2'] = rn((T_HIDDEN, T_HIDDEN)); p['b_q2'] = rn((1, T_HIDDEN), 0.01)
    p['w_head_theta'] = rn((T_HIDDEN, 2 * NUM_TOPICS))
    p['b_head_theta'] = rn((1, 2 * NUM_TOPICS), 0.01)
    p['w_eta_map'] = rn((VOCAB, ETA_HIDDEN)); p['b_eta_map'] = rn((ETA_HIDDEN,), 0.01)
    lstm = []
    in_dim = ETA_HIDDEN
    for _ in range(ETA_NLAYERS):
        lstm.append({
            'w_ih': rn((in_dim, 4 * ETA_HIDDEN)),
            'w_hh': rn((ETA_HIDDEN, 4 * ETA_HIDDEN)),
            'b_ih': rn((4 * ETA_HIDDEN,), 0.01),
            'b_hh': rn((4 * ETA_HIDDEN,), 0.01),
        })
        in_dim = ETA_HIDDEN
    p['lstm'] = lstm
    p['w_mu_eta'] = rn((ETA_HIDDEN + NUM_TOPICS, NUM_TOPICS)); p['b_mu_eta'] = rn((NUM_TOPICS,), 0.01)
    p['w_ls_eta'] = rn((ETA_HIDDEN + NUM_TOPICS, NUM_TOPICS)); p['b_ls_eta'] = rn((NUM_TOPICS,), 0.01)
    return p


# ================================= main ======================================

if __name__ == "__main__":
    key = jax.random.PRNGKey(0)
    kp, kb, kt, kr, kfwd = jax.random.split(key, 5)

    params = init_params(kp)

    bows = jnp.round(jax.random.uniform(kb, (BATCH, VOCAB)) * 5.0).astype(jnp.float32)
    normalized_bows = bows / jnp.maximum(bows.sum(axis=1, keepdims=True), 1.0)
    times = jax.random.randint(kt, (BATCH,), 0, NUM_TIMES)
    rnn_inp = jax.random.uniform(kr, (NUM_TIMES, VOCAB), dtype=jnp.float32)

    out = forward_jit(params, bows, normalized_bows, times, rnn_inp, NUM_DOCS, kfwd)
    out = jax.block_until_ready(out)

    nelbo, nll, kl_eta, kl_theta, kl_alpha, citation_loss = out
    assert all(jnp.isfinite(v) for v in out), "non-finite output"
    print("KERNEL_OK")
</pallas_src>

<mosaic_0001>
module attributes {stable_mosaic.version = 11 : i64} {
  func.func @_theta_mlp_kernel(%arg0: memref<8x128xf32, #tpu.memory_space<vmem>>, %arg1: memref<8x8xf32, #tpu.memory_space<vmem>>, %arg2: memref<128x32xf32, #tpu.memory_space<vmem>>, %arg3: memref<8x32xf32, #tpu.memory_space<vmem>>, %arg4: memref<1x32xf32, #tpu.memory_space<vmem>>, %arg5: memref<32x32xf32, #tpu.memory_space<vmem>>, %arg6: memref<1x32xf32, #tpu.memory_space<vmem>>, %arg7: memref<32x16xf32, #tpu.memory_space<vmem>>, %arg8: memref<1x16xf32, #tpu.memory_space<vmem>>, %arg9: memref<8x16xf32, #tpu.memory_space<vmem>>) attributes {dimension_semantics = [], scalar_prefetch = 0 : i64, scratch_operands = 0 : i64, tpu.core_type = #tpu.core_type<tc>} {
    %c0 = arith.constant 0 : index
    %c0_0 = arith.constant 0 : index
    %0 = vector.load %arg0[%c0, %c0_0] : memref<8x128xf32, #tpu.memory_space<vmem>>, vector<8x128xf32>
    %c0_1 = arith.constant 0 : index
    %c0_2 = arith.constant 0 : index
    %1 = vector.load %arg2[%c0_1, %c0_2] : memref<128x32xf32, #tpu.memory_space<vmem>>, vector<128x32xf32>
    %cst = arith.constant dense<0.000000e+00> : vector<8x32xf32>
    %2 = tpu.matmul %0, %1, %cst {dimension_numbers = #tpu.dot_dimension_numbers<[1], [0], [0], [1], [0, 0, 1, 1], [], []>} : vector<8x128xf32>, vector<128x32xf32>, vector<8x32xf32> -> vector<8x32xf32>
    %c0_3 = arith.constant 0 : index
    %c0_4 = arith.constant 0 : index
    %3 = vector.load %arg1[%c0_3, %c0_4] : memref<8x8xf32, #tpu.memory_space<vmem>>, vector<8x8xf32>
    %c0_5 = arith.constant 0 : index
    %c0_6 = arith.constant 0 : index
    %4 = vector.load %arg3[%c0_5, %c0_6] : memref<8x32xf32, #tpu.memory_space<vmem>>, vector<8x32xf32>
    %cst_7 = arith.constant dense<0.000000e+00> : vector<8x32xf32>
    %5 = tpu.matmul %3, %4, %cst_7 {dimension_numbers = #tpu.dot_dimension_numbers<[1], [0], [0], [1], [0, 0, 1, 1], [], []>} : vector<8x8xf32>, vector<8x32xf32>, vector<8x32xf32> -> vector<8x32xf32>
    %6 = arith.addf %2, %5 : vector<8x32xf32>
    %c0_8 = arith.constant 0 : index
    %c0_9 = arith.constant 0 : index
    %7 = vector.load %arg4[%c0_8, %c0_9] : memref<1x32xf32, #tpu.memory_space<vmem>>, vector<1x32xf32>
    %8 = vector.broadcast %7 : vector<1x32xf32> to vector<8x32xf32>
    %9 = arith.addf %6, %8 : vector<8x32xf32>
    %cst_10 = arith.constant 0.000000e+00 : f32
    %10 = vector.broadcast %cst_10 : f32 to vector<8x32xf32>
    %11 = arith.maximumf %9, %10 : vector<8x32xf32>
    %c0_11 = arith.constant 0 : index
    %c0_12 = arith.constant 0 : index
    %12 = vector.load %arg5[%c0_11, %c0_12] : memref<32x32xf32, #tpu.memory_space<vmem>>, vector<32x32xf32>
    %cst_13 = arith.constant dense<0.000000e+00> : vector<8x32xf32>
    %13 = tpu.matmul %11, %12, %cst_13 {dimension_numbers = #tpu.dot_dimension_numbers<[1], [0], [0], [1], [0, 0, 1, 1], [], []>} : vector<8x32xf32>, vector<32x32xf32>, vector<8x32xf32> -> vector<8x32xf32>
    %c0_14 = arith.constant 0 : index
    %c0_15 = arith.constant 0 : index
    %14 = vector.load %arg6[%c0_14, %c0_15] : memref<1x32xf32, #tpu.memory_space<vmem>>, vector<1x32xf32>
    %15 = vector.broadcast %14 : vector<1x32xf32> to vector<8x32xf32>
    %16 = arith.addf %13, %15 : vector<8x32xf32>
    %cst_16 = arith.constant 0.000000e+00 : f32
    %17 = vector.broadcast %cst_16 : f32 to vector<8x32xf32>
    %18 = arith.maximumf %16, %17 : vector<8x32xf32>
    %c0_17 = arith.constant 0 : index
    %c0_18 = arith.constant 0 : index
    %19 = vector.load %arg7[%c0_17, %c0_18] : memref<32x16xf32, #tpu.memory_space<vmem>>, vector<32x16xf32>
    %cst_19 = arith.constant dense<0.000000e+00> : vector<8x16xf32>
    %20 = tpu.matmul %18, %19, %cst_19 {dimension_numbers = #tpu.dot_dimension_numbers<[1], [0], [0], [1], [0, 0, 1, 1], [], []>} : vector<8x32xf32>, vector<32x16xf32>, vector<8x16xf32> -> vector<8x16xf32>
    %c0_20 = arith.constant 0 : index
    %c0_21 = arith.constant 0 : index
    %21 = vector.load %arg8[%c0_20, %c0_21] : memref<1x16xf32, #tpu.memory_space<vmem>>, vector<1x16xf32>
    %22 = vector.broadcast %21 : vector<1x16xf32> to vector<8x16xf32>
    %23 = arith.addf %20, %22 : vector<8x16xf32>
    %c0_22 = arith.constant 0 : index
    %c0_23 = arith.constant 0 : index
    %24 = vector.load %arg9[%c0_22, %c0_23] : memref<8x16xf32, #tpu.memory_space<vmem>>, vector<8x16xf32>
    tpu.vector_store %arg9[%c0_22, %c0_23], %23 {strides = array<i32>} : memref<8x16xf32, #tpu.memory_space<vmem>>, vector<8x16xf32>,
    return
  }
}

module attributes {stable_mosaic.version = 11 : i64} {
  func.func @_beta_nll_kernel(%arg0: memref<32x40xf32, #tpu.memory_space<vmem>>, %arg1: memref<40x128xf32, #tpu.memory_space<vmem>>, %arg2: memref<8x8xf32, #tpu.memory_space<vmem>>, %arg3: memref<8x128xf32, #tpu.memory_space<vmem>>, %arg4: memref<8x1xi32, #tpu.memory_space<vmem>>, %arg5: memref<1x1xf32, #tpu.memory_space<vmem>>) attributes {dimension_semantics = [], scalar_prefetch = 0 : i64, scratch_operands = 0 : i64, tpu.core_type = #tpu.core_type<tc>} {
    %c0 = arith.constant 0 : index
    %c0_0 = arith.constant 0 : index
    %0 = vector.load %arg0[%c0, %c0_0] : memref<32x40xf32, #tpu.memory_space<vmem>>, vector<32x40xf32>
    %c0_1 = arith.constant 0 : index
    %c0_2 = arith.constant 0 : index
    %1 = vector.load %arg1[%c0_1, %c0_2] : memref<40x128xf32, #tpu.memory_space<vmem>>, vector<40x128xf32>
    %cst = arith.constant dense<0.000000e+00> : vector<32x128xf32>
    %2 = tpu.matmul %0, %1, %cst {dimension_numbers = #tpu.dot_dimension_numbers<[1], [0], [0], [1], [0, 0, 1, 1], [], []>} : vector<32x40xf32>, vector<40x128xf32>, vector<32x128xf32> -> vector<32x128xf32>
    %cst_3 = arith.constant dense<0xFF800000> : vector<32xf32>
    %3 = vector.multi_reduction <maximumf>, %2, %cst_3 [1] : vector<32x128xf32> to vector<32xf32>
    %4 = vector.shape_cast %3 : vector<32xf32> to vector<32x1xf32>
    %5 = vector.broadcast %4 : vector<32x1xf32> to vector<32x128xf32>
    %6 = arith.subf %2, %5 : vector<32x128xf32>
    %7 = math.exp %6 : vector<32x128xf32>
    %cst_4 = arith.constant dense<0.000000e+00> : vector<32xf32>
    %8 = vector.multi_reduction <add>, %7, %cst_4 [1] : vector<32x128xf32> to vector<32xf32>
    %9 = vector.shape_cast %8 : vector<32xf32> to vector<32x1xf32>
    %10 = vector.broadcast %9 : vector<32x1xf32> to vector<32x128xf32>
    %11 = arith.divf %7, %10 : vector<32x128xf32>
    %c0_5 = arith.constant 0 : index
    %c0_6 = arith.constant 0 : index
    %12 = vector.load %arg2[%c0_5, %c0_6] : memref<8x8xf32, #tpu.memory_space<vmem>>, vector<8x8xf32>
    %c0_7 = arith.constant 0 : index
    %c0_8 = arith.constant 0 : index
    %13 = vector.load %arg3[%c0_7, %c0_8] : memref<8x128xf32, #tpu.memory_space<vmem>>, vector<8x128xf32>
    %c0_9 = arith.constant 0 : index
    %c0_10 = arith.constant 0 : index
    %14 = vector.load %arg4[%c0_9, %c0_10] : memref<8x1xi32, #tpu.memory_space<vmem>>, vector<8x1xi32>
    %cst_11 = arith.constant 0.000000e+00 : f32
    %15 = vector.broadcast %cst_11 : f32 to vector<8x128xf32>
    %16 = vector.extract_strided_slice %11 {offsets = [0, 0], sizes = [8, 128], strides = [1, 1]} : vector<32x128xf32> to vector<8x128xf32>
    %cst_12 = arith.constant dense<0.000000e+00> : vector<8x128xf32>
    %17 = tpu.matmul %12, %16, %cst_12 {dimension_numbers = #tpu.dot_dimension_numbers<[1], [0], [0], [1], [0, 0, 1, 1], [], []>} : vector<8x8xf32>, vector<8x128xf32>, vector<8x128xf32> -> vector<8x128xf32>
    %c0_i32 = arith.constant 0 : i32
    %18 = vector.broadcast %c0_i32 : i32 to vector<8x1xi32>
    %19 = arith.cmpi eq, %14, %18 : vector<8x1xi32>
    %20 = arith.extui %19 : vector<8x1xi1> to vector<8x1xi32>
    %21 = arith.sitofp %20 : vector<8x1xi32> to vector<8x1xf32>
    %22 = vector.broadcast %21 : vector<8x1xf32> to vector<8x128xf32>
    %23 = arith.mulf %22, %17 : vector<8x128xf32>
    %24 = arith.addf %15, %23 : vector<8x128xf32>
    %25 = vector.extract_strided_slice %11 {offsets = [8, 0], sizes = [8, 128], strides = [1, 1]} : vector<32x128xf32> to vector<8x128xf32>
    %cst_13 = arith.constant dense<0.000000e+00> : vector<8x128xf32>
    %26 = tpu.matmul %12, %25, %cst_13 {dimension_numbers = #tpu.dot_dimension_numbers<[1], [0], [0], [1], [0, 0, 1, 1], [], []>} : vector<8x8xf32>, vector<8x128xf32>, vector<8x128xf32> -> vector<8x128xf32>
    %c1_i32 = arith.constant 1 : i32
    %27 = vector.broadcast %c1_i32 : i32 to vector<8x1xi32>
    %28 = arith.cmpi eq, %14, %27 : vector<8x1xi32>
    %29 = arith.extui %28 : vector<8x1xi1> to vector<8x1xi32>
    %30 = arith.sitofp %29 : vector<8x1xi32> to vector<8x1xf32>
    %31 = vector.broadcast %30 : vector<8x1xf32> to vector<8x128xf32>
    %32 = arith.mulf %31, %26 : vector<8x128xf32>
    %33 = arith.addf %24, %32 : vector<8x128xf32>
    %34 = vector.extract_strided_slice %11 {offsets = [16, 0], sizes = [8, 128], strides = [1, 1]} : vector<32x128xf32> to vector<8x128xf32>
    %cst_14 = arith.constant dense<0.000000e+00> : vector<8x128xf32>
    %35 = tpu.matmul %12, %34, %cst_14 {dimension_numbers = #tpu.dot_dimension_numbers<[1], [0], [0], [1], [0, 0, 1, 1], [], []>} : vector<8x8xf32>, vector<8x128xf32>, vector<8x128xf32> -> vector<8x128xf32>
    %c2_i32 = arith.constant 2 : i32
    %36 = vector.broadcast %c2_i32 : i32 to vector<8x1xi32>
    %37 = arith.cmpi eq, %14, %36 : vector<8x1xi32>
    %38 = arith.extui %37 : vector<8x1xi1> to vector<8x1xi32>
    %39 = arith.sitofp %38 : vector<8x1xi32> to vector<8x1xf32>
    %40 = vector.broadcast %39 : vector<8x1xf32> to vector<8x128xf32>
    %41 = arith.mulf %40, %35 : vector<8x128xf32>
    %42 = arith.addf %33, %41 : vector<8x128xf32>
    %43 = vector.extract_strided_slice %11 {offsets = [24, 0], sizes = [8, 128], strides = [1, 1]} : vector<32x128xf32> to vector<8x128xf32>
    %cst_15 = arith.constant dense<0.000000e+00> : vector<8x128xf32>
    %44 = tpu.matmul %12, %43, %cst_15 {dimension_numbers = #tpu.dot_dimension_numbers<[1], [0], [0], [1], [0, 0, 1, 1], [], []>} : vector<8x8xf32>, vector<8x128xf32>, vector<8x128xf32> -> vector<8x128xf32>
    %c3_i32 = arith.constant 3 : i32
    %45 = vector.broadcast %c3_i32 : i32 to vector<8x1xi32>
    %46 = arith.cmpi eq, %14, %45 : vector<8x1xi32>
    %47 = arith.extui %46 : vector<8x1xi1> to vector<8x1xi32>
    %48 = arith.sitofp %47 : vector<8x1xi32> to vector<8x1xf32>
    %49 = vector.broadcast %48 : vector<8x1xf32> to vector<8x128xf32>
    %50 = arith.mulf %49, %44 : vector<8x128xf32>
    %51 = arith.addf %42, %50 : vector<8x128xf32>
    %cst_16 = arith.constant 1.000000e-10 : f32
    %52 = vector.broadcast %cst_16 : f32 to vector<8x128xf32>
    %53 = arith.addf %51, %52 : vector<8x128xf32>
    %54 = math.log %53 : vector<8x128xf32>
    %55 = arith.mulf %54, %13 : vector<8x128xf32>
    %cst_17 = arith.constant 0.000000e+00 : f32
    %56 = vector.broadcast %cst_17 : f32 to vector<8x128xf32>
    %57 = arith.subf %56, %55 : vector<8x128xf32>
    %cst_18 = arith.constant dense<0.000000e+00> : vector<8xf32>
    %58 = vector.multi_reduction <add>, %57, %cst_18 [1] : vector<8x128xf32> to vector<8xf32>
    %59 = vector.shape_cast %58 : vector<8xf32> to vector<8x1xf32>
    %cst_19 = arith.constant dense<0.000000e+00> : vector<1xf32>
    %60 = vector.multi_reduction <add>, %59, %cst_19 [0] : vector<8x1xf32> to vector<1xf32>
    %61 = vector.shape_cast %60 : vector<1xf32> to vector<1x1xf32>
    %c0_20 = arith.constant 0 : index
    %c0_21 = arith.constant 0 : index
    %62 = vector.load %arg5[%c0_20, %c0_21] : memref<1x1xf32, #tpu.memory_space<vmem>>, vector<1x1xf32>
    tpu.vector_store %arg5[%c0_20, %c0_21], %61 {strides = array<i32>} : memref<1x1xf32, #tpu.memory_space<vmem>>, vector<1x1xf32>,
    return
  }
}

</mosaic_0001>

<bundles_post_ra>
// kernel: custom-call
= control target key start
LH: loop header
LB: loop body
LE: loop exit
PB: predicated region body
PF: predicated region fallthrough
CT: control target
= control target key end

     0   :  { %s6_s0 = inlined_call_operand.vmem [shape: f32[32], index: 0, kind: output, shape index: {}]  }

// kernel: forward.4
= control target key start
LH: loop header
LB: loop body
LE: loop exit
PB: predicated region body
PF: predicated region fallthrough
CT: control target
= control target key end

     0   :  { %v516_v0 = vmov 0.0|0.0   ;;  %v517_v4 = vmov 0.0   ;;  %vm518_vm0 = vmmov 0   ;;  %vm51_vm1 = vcmask 64512   ;;  %s685_s2 = inlined_call_operand.vmem [shape: f32[128,32], index: 2, kind: input, shape index: {}]   ;;  %s686_s3 = inlined_call_operand.vmem [shape: f32[8,32], index: 3, kind: input, shape index: {}]   ;;  %s687_s1 = inlined_call_operand.vmem [shape: f32[8,8], index: 1, kind: input, shape index: {}]   ;;  %s688_s0 = inlined_call_operand.vmem [shape: f32[8,128], index: 0, kind: input, shape index: {}]   ;;  %s689_s5 = inlined_call_operand.vmem [shape: f32[32,32], index: 5, kind: input, shape index: {}]   ;;  %s690_s4 = inlined_call_operand.vmem [shape: f32[1,32], index: 4, kind: input, shape index: {}]   ;;  %s691_s7 = inlined_call_operand.vmem [shape: f32[32,16], index: 7, kind: input, shape index: {}]   ;;  %s692_s6 = inlined_call_operand.vmem [shape: f32[1,32], index: 6, kind: input, shape index: {}]   ;;  %s693_s8 = inlined_call_operand.vmem [shape: f32[1,16], index: 8, kind: input, shape index: {}]   ;;  %s694_s9 = inlined_call_operand.vmem [shape: f32[8,16], index: 9, kind: output, shape index: {}]  }
   0x1   :  { %477 = vmatprep.subr.bf16.mxu1 %v516_v0  ;;  %v33_v1 = vld [vmem:[%s685_s2] sm:$0xff]  ;;  %v34_v2 = vld [vmem:[%s685_s2 + $0x8] sm:$0xff]  ;;  %v35_v3 = vld [vmem:[%s685_s2 + $0x10] sm:$0xff]  ;;  %415 = vmatprep.subr.mxu0 %v517_v4  ;;  %vm215_vm2 = vcmask 261120   ;;  %vm374_vm3 = vcmask 130048  }
   0x2   :  { %v478_v5 = vpack.c.bf16 %v34_v2, %v33_v1  ;;  %v36_v6 = vld [vmem:[%s685_s2 + $0x18] sm:$0xff]  ;;  %417 = vmatprep.mubr.msk.f32.mxu0 %vm518_vm0, %v517_v4  ;;  %452 = vmatprep.mubr.msk.f32.mxu1 %vm518_vm0, %v517_v4  ;;  %v37_v8 = vld [vmem:[%s685_s2 + $0x20] sm:$0xff]  ;;  %v38_v9 = vld [vmem:[%s685_s2 + $0x28] sm:$0xff] }
   0x3   :  { %v481_v7 = vpack.c.bf16 %v36_v6, %v35_v3  ;;  %v50_v10 = vld [vmem:[%s686_s3] sm:$0xff]  ;;  %v484_v12 = vpack.c.bf16 %v38_v9, %v37_v8  ;;  %v39_v13 = vld [vmem:[%s685_s2 + $0x30] sm:$0xff]  ;;  %v40_v14 = vld [vmem:[%s685_s2 + $0x38] sm:$0xff] }
   0x4   :  { %479 = vmatpush3.bf16.msra.mxu1 %v478_v5  ;;  %v49_v11 = vld [vmem:[%s687_s1] sm:$0xff]  ;;  %416 = vmatpush3.msra.mxu0 %v50_v10  ;;  %v487_v15 = vpack.c.bf16 %v40_v14, %v39_v13  ;;  %v42_v17 = vld [vmem:[%s685_s2 + $0x48] sm:$0xff]  ;;  %v43_v19 = vld [vmem:[%s685_s2 + $0x50] sm:$0xff] }
   0x5   :  { %480 = vmatprep.subr.bf16.mxu1 %v516_v0  ;;  %418 = vmatmul.mubr.msk.f32.vlgmr.msra.gmra.mrb[0].mxu0 %vm51_vm1, %v49_v11  ;;  %v41_v16 = vld [vmem:[%s685_s2 + $0x40] sm:$0xff]  ;;  %v44_v20 = vld [vmem:[%s685_s2 + $0x58] sm:$0xff]  ;;  %v46_v23 = vld [vmem:[%s685_s2 + $0x68] sm:$0xff] }
   0x6   :  { %501 = vmatprep.subr.bf16.mxu0 %v516_v0  ;;  %463 = vmatprep.mubr.msk.f32.mxu0 %vm518_vm0, %v517_v4  ;;  %v490_v18 = vpack.c.bf16 %v42_v17, %v41_v16  ;;  %v493_v21 = vpack.c.bf16 %v44_v20, %v43_v19  ;;  %v45_v22 = vld [vmem:[%s685_s2 + $0x60] sm:$0xff]  ;;  %v47_v25 = vld [vmem:[%s685_s2 + $0x70] sm:$0xff]  ;;  %v48_v26 = vld [vmem:[%s685_s2 + $0x78] sm:$0xff] }
   0x7   :  { %v496_v24 = vpack.c.bf16 %v46_v23, %v45_v22  ;;  %v499_v27 = vpack.c.bf16 %v48_v26, %v47_v25  ;;  %v32_v28 = vld [vmem:[%s688_s0] sm:$0xff]  ;;  %v205_v30 = vld [vmem:[%s689_s5 + $0x8] sm:$0xff]  ;;  %v206_v32 = vld [vmem:[%s689_s5 + $0x10] sm:$0xff] }
   0x8   :  { %482 = vmatpush3.bf16.msra.mxu1 %v481_v7  ;;  %v204_v29 = vld [vmem:[%s689_s5] sm:$0xff]  ;;  %v207_v33 = vld [vmem:[%s689_s5 + $0x18] sm:$0xff]  ;;  %v291_v42 = vld [vmem:[%s691_s7 + $0x8] sm:$0xff] }
   0x9   :  { %483 = vmatprep.subr.bf16.mxu1 %v516_v0  ;;  %v502_v31 = vpack.c.bf16 %v205_v30, %v204_v29  ;;  %v505_v34 = vpack.c.bf16 %v207_v33, %v206_v32  ;;  %v381_v38 = vld [vmem:[%s690_s4] ss:$0 sm:$0xff]  ;;  %v292_v46 = vld [vmem:[%s691_s7 + $0x10] sm:$0xff]  ;;  %v293_v47 = vld [vmem:[%s691_s7 + $0x18] sm:$0xff] }
   0xa   :  { %v290_v41 = vld [vmem:[%s691_s7] sm:$0xff]  ;;  %v511_v48 = vpack.c.bf16 %v293_v47, %v292_v46 }
   0xb   :  { %503 = vmatpush3.bf16.msra.mxu0 %v502_v31  ;;  %v508_v44 = vpack.c.bf16 %v291_v42, %v290_v41  ;;  %v382_v49 = vld [vmem:[%s692_s6] ss:$0 sm:$0xff] }
   0xc   :  { %485 = vmatpush3.bf16.msra.mxu1 %v484_v12  ;;  %504 = vmatprep.subr.bf16.mxu0 %v516_v0  ;;  %v384_v54 = vld [vmem:[%s693_s8] ss:$0 sm:$0xff] }
   0xd   :  { %486 = vmatprep.subr.bf16.mxu1 %v516_v0 }
   0xf   :  { %506 = vmatpush3.bf16.msra.mxu0 %v505_v34 }
  0x10   :  { %488 = vmatpush3.bf16.msra.mxu1 %v487_v15  ;;  %507 = vmatprep.subr.bf16.mxu0 %v516_v0 }
  0x11   :  { %489 = vmatprep.subr.bf16.mxu1 %v516_v0 }
  0x14   :  { %491 = vmatpush3.bf16.msra.mxu1 %v490_v18 }
  0x15   :  { %492 = vmatprep.subr.bf16.mxu1 %v516_v0 }
  0x18   :  { %494 = vmatpush3.bf16.msra.mxu1 %v493_v21 }
  0x19   :  { %495 = vmatprep.subr.bf16.mxu1 %v516_v0 }
  0x1c   :  { %497 = vmatpush3.bf16.msra.mxu1 %v496_v24 }
  0x1d   :  { %498 = vmatprep.subr.bf16.mxu1 %v516_v0 }
  0x20   :  { %500 = vmatpush3.bf16.msra.mxu1 %v499_v27 }
  0x23   :  { %453 = vmatmul.mubr.f32.vlgmr.msra.gmra.mrb[0].mxu1 %v32_v28 }
  0xd8   :  { %v121_v35 = vpop.f32.mrb[0].mxu0 }
  0xd9   :  { %v419_v36 = vpop.f32.mrb[1].mxu0 }
  0xf6   :  { %v191_v37 = vpop.f32.mrb[0].mxu1 }
  0xf7   :  { %v192_v39 = vadd.f32 %v191_v37, %v121_v35  ;;  %v454_v40 = vpop.f32.mrb[1].mxu1 }
  0xf9   :  { %v202_v43 = vadd.f32 %v381_v38, %v192_v39 }
  0xfb   :  { %v203_v45 = vmax.f32 %v202_v43, 0.0 }
  0xfd   :  { %464 = vmatmul.mubr.msk.f32.vlgmr.msra.gmra.mrb[2].mxu0 %vm215_vm2, %v203_v45 }
  0xfe   :  { %509 = vmatpush3.bf16.msra.mxu0 %v508_v44  ;;  %474 = vmatprep.mubr.msk.f32.mxu0 %vm518_vm0, %v517_v4 }
  0xff   :  { %510 = vmatprep.subr.bf16.mxu0 %v516_v0 }
 0x102   :  { %512 = vmatpush3.bf16.msra.mxu0 %v511_v48 }
 0x1d0   :  { %v285_v50 = vpop.f32.mrb[2].mxu0 }
 0x1d1   :  { %v286_v51 = vadd.f32 %v382_v49, %v285_v50  ;;  %v465_v52 = vpop.f32.mrb[3].mxu0 }
 0x1d3   :  { %v289_v53 = vmax.f32 %v286_v51, 0.0 }
 0x1d5   :  { %475 = vmatmul.mubr.msk.f32.vlgmr.msra.gmra.mrb[4].mxu0 %vm215_vm2, %v289_v53 }
 0x2a8   :  { %v370_v55 = vpop.f32.mrb[4].mxu0 }
 0x2a9   :  { %v371_v56 = vadd.f32 %v384_v54, %v370_v55  ;;  %v476_v57 = vpop.f32.mrb[5].mxu0 }
 0x2ab   :  { %375 = vst.msk [vmem:[%s694_s9] sm:$0xff] %vm374_vm3, %v371_v56 }

// kernel: forward.5
= control target key start
LH: loop header
LB: loop body
LE: loop exit
PB: predicated region body
PF: predicated region fallthrough
CT: control target
= control target key end

     0   :  { %vm30_vm0 = vcmask 326656   ;;  %s740_s0 = inlined_call_operand.vmem [shape: f32[32,40], index: 0, kind: input, shape index: {}]   ;;  %s741_s1 = inlined_call_operand.vmem [shape: f32[40,128], index: 1, kind: input, shape index: {}]   ;;  %s742_s2 = inlined_call_operand.vmem [shape: f32[8,8], index: 2, kind: input, shape index: {}]   ;;  %s743_s3 = inlined_call_operand.vmem [shape: f32[8,128], index: 3, kind: input, shape index: {}]   ;;  %s744_s4 = inlined_call_operand.vmem [shape: s32[8,1], index: 4, kind: input, shape index: {}]   ;;  %s745_s5 = inlined_call_operand.hbm [shape: f32[1,1], index: 5, kind: output, shape index: {}]  }
   0x1   :  { %v25_v0 = vld [vmem:[%s741_s1] sm:$0xff]  ;;  %v26_v1 = vld [vmem:[%s741_s1 + $0x8] sm:$0xff]  ;;  %v27_v2 = vld [vmem:[%s741_s1 + $0x10] sm:$0xff] }
   0x2   :  { %v585_v3 = vpack.c.bf16 %v26_v1, %v25_v0  ;;  %v28_v4 = vld [vmem:[%s741_s1 + $0x18] sm:$0xff]  ;;  %v21_v5 = vld [vmem:[%s740_s0] sm:$0xff] }
   0x3   :  { %v589_v6 = vpack.c.bf16 %v28_v4, %v27_v2  ;;  %559 = vmatprep.mubr.msk.f32.mxu0 %vm30_vm0, %v21_v5 }
   0x4   :  { %586 = vmatprep.subr.bf16.mxu0 %v585_v3 }
   0x5   :  { %10 = vsyncpa [#allocation3], 0  ;;  %588 = vmatpush3.bf16.msra.mxu0 %v585_v3  ;;  %v29_v7 = vld [vmem:[%s741_s1 + $0x20] sm:$0xff]  ;;  %v22_v8 = vld [vmem:[%s740_s0 + $0x8] sm:$0xff]  ;;  %v646_v31 = vmov 0.0   ;;  %vm647_vm1 = vmmov 0  }
   0x6   :  { %590 = vmatprep.subr.bf16.mxu0 %v589_v6  ;;  %v23_v9 = vld [vmem:[%s740_s0 + $0x10] sm:$0xff]  ;;  %v24_v10 = vld [vmem:[%s740_s0 + $0x18] sm:$0xff]  ;;  %565 = vmatprep.subr.mxu1 %v646_v31  ;;  %v166_v32 = vld [vmem:[%s744_s4] sm:$0xff]  ;;  %v648_v33 = vmov 0   ;;  %vm167_vm6 = vcmask 64512   ;;  %s649_s13 = smov [#allocation2]  }
   0x7   :  { %567 = vmatprep.mubr.msk.f32.mxu1 %vm647_vm1, %v646_v31  ;;  %597 = vset.pattern.permute.xlu0 %v648_v33  ;;  %vm241_vm2 = vcmp.eq.s32.totalorder %v166_v32, 0  ;;  %vm321_vm3 = vcmp.eq.s32.totalorder %v166_v32, 1  ;;  %vm401_vm4 = vcmp.eq.s32.totalorder %v166_v32, 2  ;;  %vm481_vm5 = vcmp.eq.s32.totalorder %v166_v32, 3  ;;  %v164_v45 = vld [vmem:[%s742_s2] sm:$0xff]  ;;  %s512_s14 = sshll.u32 %s649_s13, 4  ;;  %s513_s14 = int_to_ptr.vmem [resolvable:$true] %s512_s14 }
   0x8   :  { %603 = vset.pattern.permute.xlu1 %v648_v33  ;;  %v525_v34 = vsel %vm241_vm2, 1.0, %v646_v31  ;;  %v527_v35 = vsel %vm321_vm3, 1.0, %v646_v31  ;;  %v529_v36 = vsel %vm401_vm4, 1.0, %v646_v31  ;;  %v531_v38 = vsel %vm481_vm5, 1.0, %v646_v31  ;;  %s622_s15 = scalar_lea.vmem %s513_s14, 16  ;;  %s626_s16 = scalar_lea.vmem %s513_s14, 32 }
   0x9   :  { %592 = vmatpush3.bf16.msra.mxu0 %v589_v6  ;;  %v598_v37 = vpack.i.bf16 %v527_v35, %v525_v34  ;;  %vm504_vm7 = vcmask 0   ;;  %p623_p0 = scmp.ne.s32.totalorder %s513_s14, %s622_s15  ;;  %p627_p1 = scmp.lt.s32.totalorder %s513_s14, %s513_s14 }
   0xa   :  { %557 = vmatprep.subr.mxu0 %v29_v7  ;;  %p628_p2 = scmp.lt.s32.totalorder %s626_s16, %s622_s15 }
   0xc   :  { %p629_p3 = por %p628_p2, %p627_p1 }
   0xd   :  { %558 = vmatpush3.msra.mxu0 %v29_v7 }
   0xe   :  { %560 = vmatmul.mubr.msk.f32.vlgmr.msra.gmra.mrb[0].mxu0 %vm30_vm0, %v22_v8  ;;  %p630_p4 = pnand %p629_p3, %p623_p0 }
   0xf   :  { %562 = vmatprep.mubr.msk.f32.mxu0 %vm30_vm0, %v23_v9 }
  0x12   :  { %563 = vmatmul.mubr.msk.f32.gmra.mrb[2].mxu0 %vm30_vm0, %v24_v10  ;;  %v165_v10 = vld [vmem:[%s743_s3] sm:$0xff] }
  0xe1   :  { %v561_v11 = vpop.f32.mrb[0].mxu0 }
  0xe2   :  { %v109_v12 = vpop.f32.mrb[1].mxu0 }
  0xe3   :  { %128 = vmax.xlane.f32.xlu0 %v109_v12 }
  0xe5   :  { %v564_v13 = vpop.f32.mrb[2].mxu0 }
  0xe6   :  { %v119_v14 = vpop.f32.mrb[3].mxu0 }
  0xe7   :  { %130 = vmax.xlane.f32.xlu0 %v561_v11  ;;  %132 = vmax.xlane.f32.xlu1 %v119_v14 }
  0xeb   :  { %134 = vmax.xlane.f32.xlu1 %v564_v13 }
 0x170   :  { %v129_v15 = vpop.xlane.xlu0 %128 }
 0x171   :  { %v136_v16 = vsub.f32 %v109_v12, %v129_v15 }
 0x173   :  { %v140_v17 = vmul.f32 1.442695, %v136_v16 }
 0x174   :  { %v131_v18 = vpop.xlane.xlu0 %130  ;;  %v133_v19 = vpop.xlane.xlu1 %132 }
 0x175   :  { %604 = vpow2.f32 %v140_v17  ;;  %v137_v20 = vsub.f32 %v561_v11, %v131_v18  ;;  %v138_v21 = vsub.f32 %v119_v14, %v133_v19 }
 0x177   :  { %v142_v22 = vmul.f32 1.442695, %v137_v20  ;;  %v144_v23 = vmul.f32 1.442695, %v138_v21 }
 0x178   :  { %v135_v24 = vpop.xlane.xlu1 %134 }
 0x179   :  { %606 = vpow2.f32 %v142_v22  ;;  %v139_v25 = vsub.f32 %v564_v13, %v135_v24 }
 0x17a   :  { %608 = vpow2.f32 %v144_v23 }
 0x17b   :  { %v146_v26 = vmul.f32 1.442695, %v139_v25 }
 0x17d   :  { %610 = vpow2.f32 %v146_v26 }
 0x17f   :  { %v605_v27 = vpop.eup %604 }
 0x180   :  { %148 = vadd.xlane.f32.xlu0 %v605_v27 }
 0x183   :  { %v607_v28 = vpop.eup %606 }
 0x184   :  { %v609_v29 = vpop.eup %608  ;;  %150 = vadd.xlane.f32.xlu1 %v607_v28 }
 0x185   :  { %152 = vadd.xlane.f32.xlu0 %v609_v29 }
 0x187   :  { %v611_v30 = vpop.eup %610 }
 0x188   :  { %154 = vadd.xlane.f32.xlu1 %v611_v30 }
 0x199   :  { %406 = vperm.xlu1 %603, %v529_v36  }
 0x19b   :  { %599 = vperm.xlu0 %597, %v598_v37  }
 0x19d   :  { %486 = vperm.xlu1 %603, %v531_v38  }
 0x20d   :  { %v149_v39 = vpop.xlane.xlu0 %148 }
 0x20e   :  { %612 = vrcp.f32 %v149_v39 }
 0x211   :  { %v151_v40 = vpop.xlane.xlu1 %150 }
 0x212   :  { %v153_v41 = vpop.xlane.xlu0 %152  ;;  %614 = vrcp.f32 %v151_v40 }
 0x213   :  { %616 = vrcp.f32 %v153_v41 }
 0x215   :  { %v155_v42 = vpop.xlane.xlu1 %154 }
 0x216   :  { %618 = vrcp.f32 %v155_v42 }
 0x218   :  { %v613_v43 = vpop.eup %612 }
 0x219   :  { %v157_v44 = vmul.f32 %v613_v43, %v605_v27  ;;  %v407_v61 = vpop.permute.xlu1 %406 }
 0x21a   :  { %v600_v52 = vpop.permute.xlu0 %599 }
 0x21b   :  { %566 = vmatpush3.msra.mxu1 %v157_v44  ;;  %v602_v54 = vunpack.i.h.bf16 %v600_v52  ;;  %v601_v55 = vunpack.i.l.bf16 %v600_v52 }
 0x21c   :  { %v615_v46 = vpop.eup %614  ;;  %568 = vmatmul.mubr.msk.f32.vlgmr.msra.gmra.mrb[0].mxu1 %vm167_vm6, %v164_v45  ;;  %570 = vmatprep.subr.mxu1 %v646_v31 }
 0x21d   :  { %v617_v47 = vpop.eup %616  ;;  %v159_v48 = vmul.f32 %v615_v46, %v607_v28  ;;  %572 = vmatprep.mubr.msk.f32.mxu1 %vm647_vm1, %v646_v31  ;;  %v487_v3 = vpop.permute.xlu1 %486 }
 0x21e   :  { %v161_v49 = vmul.f32 %v617_v47, %v609_v29 }
 0x21f   :  { %571 = vmatpush3.msra.mxu1 %v159_v48 }
 0x220   :  { %v619_v50 = vpop.eup %618  ;;  %573 = vmatmul.mubr.msk.f32.vlgmr.msra.gmra.mrb[2].mxu1 %vm167_vm6, %v164_v45  ;;  %575 = vmatprep.subr.mxu1 %v646_v31 }
 0x221   :  { %576 = vmatpush3.msra.mxu1 %v161_v49  ;;  %577 = vmatprep.mubr.msk.f32.mxu1 %vm647_vm1, %v646_v31  ;;  %v163_v51 = vmul.f32 %v619_v50, %v611_v30 }
 0x222   :  { %580 = vmatprep.subr.mxu1 %v646_v31 }
 0x224   :  { %578 = vmatmul.mubr.msk.f32.vlgmr.msra.gmra.mrb[4].mxu1 %vm167_vm6, %v164_v45 }
 0x225   :  { %581 = vmatpush3.msra.mxu1 %v163_v51  ;;  %582 = vmatprep.mubr.msk.f32.mxu1 %vm647_vm1, %v646_v31 }
 0x228   :  { %583 = vmatmul.mubr.msk.f32.vlgmr.msra.gmra.mrb[6].mxu1 %vm167_vm6, %v164_v45 }
 0x2ef   :  { %v237_v53 = vpop.f32.mrb[0].mxu1 }
 0x2f0   :  { %v569_v56 = vpop.f32.mrb[1].mxu1  ;;  %v249_v58 = vmul.f32 %v601_v55, %v237_v53 }
 0x2f3   :  { %v317_v57 = vpop.f32.mrb[2].mxu1 }
 0x2f4   :  { %v329_v59 = vmul.f32 %v602_v54, %v317_v57  ;;  %v574_v60 = vpop.f32.mrb[3].mxu1 }
 0x2f6   :  { %v330_v62 = vadd.f32 %v329_v59, %v249_v58 }
 0x2f7   :  { %v397_v63 = vpop.f32.mrb[4].mxu1 }
 0x2f8   :  { %v409_v0 = vmul.f32 %v407_v61, %v397_v63  ;;  %v579_v1 = vpop.f32.mrb[5].mxu1 }
 0x2fa   :  { %v410_v2 = vadd.f32 %v409_v0, %v330_v62 }
 0x2fb   :  { %v477_v4 = vpop.f32.mrb[6].mxu1 }
 0x2fc   :  { %v489_v5 = vmul.f32 %v487_v3, %v477_v4  ;;  %v584_v6 = vpop.f32.mrb[7].mxu1 }
 0x2fe   :  { %v490_v7 = vadd.f32 %v489_v5, %v410_v2 }
 0x300   :  { %v491_v8 = vadd.f32 1e-10, %v490_v7 }
 0x302   :  { %620 = vlog2.f32 %v491_v8 }
 0x30c   :  { %v621_v9 = vpop.eup %620 }
 0x30d   :  { %v493_v11 = vmul.f32 0.6931472, %v621_v9 }
 0x30f   :  { %v494_v12 = vmul.f32 %v493_v11, %v165_v10 }
 0x311   :  { %v495_v13 = vsub.f32 0.0, %v494_v12 }
 0x313   :  { %496 = vadd.xlane.f32.xlu1 %v495_v13 }
 0x3a0   :  { %v497_v14 = vpop.xlane.xlu1 %496 }
 0x3a1   :  { %v498_v15 = vrot.slane %v497_v14, 4 }
 0x3a3   :  { %v499_v16 = vadd.f32 %v498_v15, %v497_v14 }
 0x3a5   :  { %v500_v17 = vrot.slane %v499_v16, 2 }
 0x3a7   :  { %v501_v18 = vadd.f32 %v500_v17, %v499_v16 }
 0x3a9   :  { %v502_v19 = vrot.slane %v501_v18, 1 }
 0x3ab   :  { %v503_v20 = vadd.f32 %v502_v19, %v501_v18 }
 0x3ad   :  { %505 = vst.msk [vmem:[#allocation2] sm:$0x1] %vm504_vm7, %v503_v20 }
 0x3ae   :  { %633 = shalt.err (!%p630_p4)
}
 0x3af   :  { %s634_s18 = scalar_lea.hbm %s745_s5, 16 }
 0x3b0   :  { %p635_p5 = scmp.ne.s32.totalorder %s745_s5, %s634_s18  ;;  %p638_p6 = scmp.lt.u32.totalorder %s634_s18, %s745_s5 }
 0x3b2   :  { %p640_p7 = pnand %p638_p6, %p635_p5 }
 0x3b4   :  { %643 = shalt.err (!%p640_p7)
}
 0x3b5   :  { %515 = dma.vmem_to_hbm [thread:$0]  %s513_s14, 16, %s745_s5, [#allocation3]  }
 0x3b6   :  { %644 = dma.done.wait [#allocation3], 16  }
 0x3b7   :  { %645 = vsyncadd [#allocation3], 4294967280 }
 0x3b8   :  { %519 = vsyncpa [#allocation3], 1 }

</bundles_post_ra>
